<compile_context>
chip_gen: v6e
topology: v6e:2x2x1
jax: 0.10.0
libtpu: 0.0.40
codegen_flags: <defaults>
</compile_context>

<pallas_src>
import math
import functools

import jax
import jax.numpy as jnp
from jax.experimental import pallas as pl
from jax.experimental.pallas import tpu as pltpu


# ----------------------------- configuration -----------------------------
EMB_DIMS = (32, 48, 64)        # emb1_dim, emb2_dim, emb3_dim
L2_DIM = 32
D_MODEL = 3 * L2_DIM           # 96 — ScoreHead.d_model must match concat width
NUM_CLASSES = 8
PAD = 128                      # lane-dense padded width
LN_EPS = 1e-5
BATCH = 8

# Weight-slab row layout (everything padded to 128 lanes, rows 8-aligned):
L1_STRIDE = 64                 # one 64-row band per encoder group (max emb dim)
L2_OFF = 3 * L1_STRIDE         # 192 : three [128,128] L2 blocks
DW_OFF = L2_OFF + 3 * PAD      # 576 : ScoreHead dense   [96,96]  -> [128,128]
DEC_OFF = DW_OFF + PAD         # 704 : ScoreHead decoder [96, 8]  -> [128,128]
W_ROWS = DEC_OFF + PAD         # 832 total rows (~416 KiB, one DMA)

# Bias/LN slab rows (one (8,128) vreg):
B_L1 = (0, 1, 2)               # per-group L1 biases
B_L2 = 3                       # concatenated L2 biases (96 real lanes)
B_DENSE = 4                    # ScoreHead dense bias
B_LNW = 5                      # LayerNorm weight
B_LNB = 6                      # LayerNorm bias
B_DEC = 7                      # ScoreHead decoder bias (self.bias)


def _gelu_erf(x):
    # exact ESM gelu: x * 0.5 * (1 + erf(x / sqrt(2)))
    return x * 0.5 * (1.0 + jax.lax.erf(x / math.sqrt(2.0)))


# ------------------------------- kernel ----------------------------------
def moemb_kernel(a1_ref, a2_ref, a3_ref, b1_ref, b2_ref, b3_ref,
                 w_ref, bias_ref, out_ref, *, ln_eps):
    biases = bias_ref[...]                       # [8,128] — single vreg, hoisted

    def encode(e_refs):
        # Per-group L1 (ReLU; dropout = identity in eval) then L2; the padded
        # [d_g,128] L1 weights and [128,128] L2 blocks keep every activation
        # lane-dense while accumulating the concatenated 96-wide rep directly.
        rep = None
        for g, e_ref in enumerate(e_refs):
            d = EMB_DIMS[g]
            w1 = w_ref[g * L1_STRIDE: g * L1_STRIDE + d, :]            # [d,128]
            h = jnp.dot(e_ref[...], w1, preferred_element_type=jnp.float32)
            h = jnp.maximum(h + biases[B_L1[g]:B_L1[g] + 1, :], 0.0)   # pad lanes stay 0
            w2 = w_ref[L2_OFF + g * PAD: L2_OFF + (g + 1) * PAD, :]    # [128,128]
            c = jnp.dot(h, w2, preferred_element_type=jnp.float32)
            rep = c if rep is None else rep + c
        rep = rep + biases[B_L2:B_L2 + 1, :]                           # [bt,128]
        # F.normalize(p=2, dim=1): pad lanes are zero, so the 128-lane sum
        # equals the 96-feature sum; single rsqrt on the EUP.
        sumsq = jnp.sum(rep * rep, axis=-1, keepdims=True)
        return rep * jax.lax.rsqrt(jnp.maximum(sumsq, 1e-24))

    rep_a = encode((a1_ref, a2_ref, a3_ref))
    rep_b = encode((b1_ref, b2_ref, b3_ref))
    dist = jnp.abs(rep_a - rep_b)                                      # [bt,128]

    # ---- ScoreHead: dense -> gelu -> LayerNorm(96) -> decoder (+ bias) ----
    s = jnp.dot(dist, w_ref[DW_OFF:DW_OFF + PAD, :],
                preferred_element_type=jnp.float32)
    s = _gelu_erf(s + biases[B_DENSE:B_DENSE + 1, :])                  # gelu(0)=0 on pads

    # LayerNorm statistics over exactly D_MODEL=96 real features.
    lane = jax.lax.broadcasted_iota(jnp.int32, s.shape, 1)
    real = lane < D_MODEL
    mu = jnp.sum(s, axis=-1, keepdims=True) * (1.0 / D_MODEL)          # pads are zero
    diff = jnp.where(real, s - mu, 0.0)
    var = jnp.sum(diff * diff, axis=-1, keepdims=True) * (1.0 / D_MODEL)
    s = diff * jax.lax.rsqrt(var + ln_eps) * biases[B_LNW:B_LNW + 1, :] \
        + biases[B_LNB:B_LNB + 1, :]

    logits = jnp.dot(s, w_ref[DEC_OFF:DEC_OFF + PAD, :],
                     preferred_element_type=jnp.float32)
    out_ref[...] = (logits + biases[B_DEC:B_DEC + 1, :]).astype(out_ref.dtype)


# ------------------------- wrapper-side packing ----------------------------
def pack_params(params):
    """Fold all parameters into one lane-dense weight slab [832,128] and one
    bias/LN slab [8,128] (two DMAs total).  One-time, host/XLA side."""
    (w1l1, b1l1, w1l2, b1l2,
     w2l1, b2l1, w2l2, b2l2,
     w3l1, b3l1, w3l2, b3l2,
     dw, db, lnw, lnb, decw, decb) = params

    w_slab = jnp.zeros((W_ROWS, PAD), jnp.float32)
    for g, (w, d) in enumerate(zip((w1l1, w2l1, w3l1), EMB_DIMS)):
        w_slab = w_slab.at[g * L1_STRIDE: g * L1_STRIDE + d, :d].set(w)
    for g, (w, d) in enumerate(zip((w1l2, w2l2, w3l2), EMB_DIMS)):
        r0 = L2_OFF + g * PAD
        w_slab = w_slab.at[r0: r0 + d, g * L2_DIM:(g + 1) * L2_DIM].set(w)
    w_slab = w_slab.at[DW_OFF: DW_OFF + D_MODEL, :D_MODEL].set(dw)
    w_slab = w_slab.at[DEC_OFF: DEC_OFF + D_MODEL, :NUM_CLASSES].set(decw)

    b_slab = jnp.zeros((8, PAD), jnp.float32)
    for g, (b, d) in enumerate(zip((b1l1, b2l1, b3l1), EMB_DIMS)):
        b_slab = b_slab.at[B_L1[g], :d].set(b[0])
    l2b = jnp.concatenate([b1l2, b2l2, b3l2], axis=-1)
    b_slab = b_slab.at[B_L2, :D_MODEL].set(l2b[0])
    b_slab = b_slab.at[B_DENSE, :D_MODEL].set(db[0])
    b_slab = b_slab.at[B_LNW, :D_MODEL].set(lnw[0])
    b_slab = b_slab.at[B_LNB, :D_MODEL].set(lnb[0])
    b_slab = b_slab.at[B_DEC, :NUM_CLASSES].set(decb[0])
    return w_slab, b_slab


# ------------------------------ wrapper -----------------------------------
def moemb_forward(batch, packed_params, *, num_classes=NUM_CLASSES,
                  ln_eps=LN_EPS, batch_tile=None):
    w_slab, b_slab = packed_params
    a1, a2, a3 = batch["a_emb1"], batch["a_emb2"], batch["a_emb3"]
    b1, b2, b3 = batch["b_emb1"], batch["b_emb2"], batch["b_emb3"]
    B = a1.shape[0]

    # Parallel batch grid: weights stay VMEM-resident (constant index map);
    # tiles shard across TensorCores on v7x.  At B=8 this is a single step.
    bt = batch_tile if batch_tile is not None else min(B, 256)
    nsteps = pl.cdiv(B, bt)

    def in_spec(d):
        return pl.BlockSpec((bt, d), lambda i: (i, 0))

    def full_spec(shape):
        return pl.BlockSpec(shape, lambda i: (0, 0))

    out_padded = pl.pallas_call(
        functools.partial(moemb_kernel, ln_eps=ln_eps),
        out_shape=jax.ShapeDtypeStruct((B, PAD), jnp.float32),
        grid=(nsteps,),
        in_specs=[in_spec(EMB_DIMS[0]), in_spec(EMB_DIMS[1]), in_spec(EMB_DIMS[2]),
                  in_spec(EMB_DIMS[0]), in_spec(EMB_DIMS[1]), in_spec(EMB_DIMS[2]),
                  full_spec((W_ROWS, PAD)), full_spec((8, PAD))],
        out_specs=pl.BlockSpec((bt, PAD), lambda i: (i, 0)),
        compiler_params=pltpu.CompilerParams(
            dimension_semantics=("parallel",)),
    )(a1, a2, a3, b1, b2, b3, w_slab, b_slab)
    # NOTE: consumers that can take the lane-padded (B,128) result should,
    # to avoid this extra slice/launch on the overhead-dominated path.
    return out_padded[:, :num_classes]


# -------------------------- parameter creation ----------------------------
def make_params(key):
    ks = iter(jax.random.split(key, 16))

    def lin(kin, d_in, d_out, std):
        # stored as [in, out] (PyTorch weight transposed); bias as [1, out]
        w = jax.random.normal(kin, (d_in, d_out), jnp.float32) * std
        b = jnp.zeros((1, d_out), jnp.float32)
        return w, b

    p = []
    for d in EMB_DIMS:
        w1, b1 = lin(next(ks), d, d, 0.1)          # net{i}_l1
        w2, b2 = lin(next(ks), d, L2_DIM, 0.1)     # net{i}_l2
        p += [w1, b1, w2, b2]

    # ScoreHead
    dw, db = lin(next(ks), D_MODEL, D_MODEL, 0.02)             # dense
    lnw = jnp.ones((1, D_MODEL), jnp.float32)                  # layer_norm
    lnb = jnp.zeros((1, D_MODEL), jnp.float32)
    decw = jax.random.normal(next(ks), (D_MODEL, NUM_CLASSES), jnp.float32) * 0.02
    decb = jnp.zeros((1, NUM_CLASSES), jnp.float32)            # self.bias
    p += [dw, db, lnw, lnb, decw, decb]
    return p


# ----------------------- plain-JAX reference check -------------------------
def moemb_reference(batch, params):
    (w1l1, b1l1, w1l2, b1l2,
     w2l1, b2l1, w2l2, b2l2,
     w3l1, b3l1, w3l2, b3l2,
     dw, db, lnw, lnb, decw, decb) = params

    def enc(e1, e2, e3):
        o1 = jnp.maximum(e1 @ w1l1 + b1l1, 0.0) @ w1l2 + b1l2
        o2 = jnp.maximum(e2 @ w2l1 + b2l1, 0.0) @ w2l2 + b2l2
        o3 = jnp.maximum(e3 @ w3l1 + b3l1, 0.0) @ w3l2 + b3l2
        return jnp.concatenate([o1, o2, o3], axis=-1)

    r1 = enc(batch["a_emb1"], batch["a_emb2"], batch["a_emb3"])
    r2 = enc(batch["b_emb1"], batch["b_emb2"], batch["b_emb3"])

    def nrm(x):
        return x / jnp.maximum(jnp.linalg.norm(x, axis=-1, keepdims=True), 1e-12)

    d = jnp.abs(nrm(r1) - nrm(r2))
    h = _gelu_erf(d @ dw + db)
    mu = jnp.mean(h, axis=-1, keepdims=True)
    var = jnp.mean((h - mu) ** 2, axis=-1, keepdims=True)
    h = (h - mu) * jax.lax.rsqrt(var + LN_EPS) * lnw + lnb
    return h @ decw + decb


# --------------------------------- main ------------------------------------
if __name__ == "__main__":
    key = jax.random.PRNGKey(0)
    kp, k1, k2, k3, k4, k5, k6 = jax.random.split(key, 7)

    params = make_params(kp)
    packed = pack_params(params)

    batch = {
        "a_emb1": jax.random.normal(k1, (BATCH, EMB_DIMS[0]), jnp.float32),
        "a_emb2": jax.random.normal(k2, (BATCH, EMB_DIMS[1]), jnp.float32),
        "a_emb3": jax.random.normal(k3, (BATCH, EMB_DIMS[2]), jnp.float32),
        "b_emb1": jax.random.normal(k4, (BATCH, EMB_DIMS[0]), jnp.float32),
        "b_emb2": jax.random.normal(k5, (BATCH, EMB_DIMS[1]), jnp.float32),
        "b_emb3": jax.random.normal(k6, (BATCH, EMB_DIMS[2]), jnp.float32),
    }

    logits = moemb_forward(batch, packed)
    logits = jax.block_until_ready(logits)

    ref = moemb_reference(batch, params)
    assert logits.shape == (BATCH, NUM_CLASSES)
    assert jnp.allclose(logits, ref, atol=1e-4, rtol=1e-4), "mismatch vs reference"

    print("KERNEL_OK")
</pallas_src>

<mosaic_0001>
module attributes {stable_mosaic.version = 11 : i64} {
  func.func @moemb_kernel(%arg0: i32, %arg1: memref<8x32xf32, #tpu.memory_space<vmem>>, %arg2: memref<8x48xf32, #tpu.memory_space<vmem>>, %arg3: memref<8x64xf32, #tpu.memory_space<vmem>>, %arg4: memref<8x32xf32, #tpu.memory_space<vmem>>, %arg5: memref<8x48xf32, #tpu.memory_space<vmem>>, %arg6: memref<8x64xf32, #tpu.memory_space<vmem>>, %arg7: memref<832x128xf32, #tpu.memory_space<vmem>>, %arg8: memref<8x128xf32, #tpu.memory_space<vmem>>, %arg9: memref<8x128xf32, #tpu.memory_space<vmem>>) attributes {dimension_semantics = [#tpu.dimension_semantics<parallel>], iteration_bounds = array<i64: 1>, scalar_prefetch = 0 : i64, scratch_operands = 0 : i64, tpu.core_type = #tpu.core_type<tc>, window_params = [{transform_indices = @transform_0, window_bounds = array<i64: 8, 32>}, {transform_indices = @transform_1, window_bounds = array<i64: 8, 48>}, {transform_indices = @transform_2, window_bounds = array<i64: 8, 64>}, {transform_indices = @transform_3, window_bounds = array<i64: 8, 32>}, {transform_indices = @transform_4, window_bounds = array<i64: 8, 48>}, {transform_indices = @transform_5, window_bounds = array<i64: 8, 64>}, {pipeline_mode = #tpu.pipeline_mode<synchronous>, transform_indices = @transform_6, window_bounds = array<i64: 832, 128>}, {pipeline_mode = #tpu.pipeline_mode<synchronous>, transform_indices = @transform_7, window_bounds = array<i64: 8, 128>}, {transform_indices = @transform_8, window_bounds = array<i64: 8, 128>}]} {
    %c0 = arith.constant 0 : index
    %c0_0 = arith.constant 0 : index
    %0 = vector.load %arg8[%c0, %c0_0] : memref<8x128xf32, #tpu.memory_space<vmem>>, vector<8x128xf32>
    %c0_1 = arith.constant 0 : index
    %c0_2 = arith.constant 0 : index
    %1 = vector.load %arg7[%c0_1, %c0_2] : memref<832x128xf32, #tpu.memory_space<vmem>>, vector<32x128xf32>
    %c0_3 = arith.constant 0 : index
    %c0_4 = arith.constant 0 : index
    %2 = vector.load %arg1[%c0_3, %c0_4] : memref<8x32xf32, #tpu.memory_space<vmem>>, vector<8x32xf32>
    %cst = arith.constant dense<0.000000e+00> : vector<8x128xf32>
    %3 = tpu.matmul %2, %1, %cst {dimension_numbers = #tpu.dot_dimension_numbers<[1], [0], [0], [1], [0, 0, 1, 1], [], []>} : vector<8x32xf32>, vector<32x128xf32>, vector<8x128xf32> -> vector<8x128xf32>
    %4 = vector.extract_strided_slice %0 {offsets = [0, 0], sizes = [1, 128], strides = [1, 1]} : vector<8x128xf32> to vector<1x128xf32>
    %5 = vector.broadcast %4 : vector<1x128xf32> to vector<8x128xf32>
    %6 = arith.addf %3, %5 : vector<8x128xf32>
    %cst_5 = arith.constant 0.000000e+00 : f32
    %7 = vector.broadcast %cst_5 : f32 to vector<8x128xf32>
    %8 = arith.maximumf %6, %7 : vector<8x128xf32>
    %c192 = arith.constant 192 : index
    %c0_6 = arith.constant 0 : index
    %9 = vector.load %arg7[%c192, %c0_6] : memref<832x128xf32, #tpu.memory_space<vmem>>, vector<128x128xf32>
    %cst_7 = arith.constant dense<0.000000e+00> : vector<8x128xf32>
    %10 = tpu.matmul %8, %9, %cst_7 {dimension_numbers = #tpu.dot_dimension_numbers<[1], [0], [0], [1], [0, 0, 1, 1], [], []>} : vector<8x128xf32>, vector<128x128xf32>, vector<8x128xf32> -> vector<8x128xf32>
    %c64 = arith.constant 64 : index
    %c0_8 = arith.constant 0 : index
    %11 = vector.load %arg7[%c64, %c0_8] : memref<832x128xf32, #tpu.memory_space<vmem>>, vector<48x128xf32>
    %c0_9 = arith.constant 0 : index
    %c0_10 = arith.constant 0 : index
    %12 = vector.load %arg2[%c0_9, %c0_10] : memref<8x48xf32, #tpu.memory_space<vmem>>, vector<8x48xf32>
    %cst_11 = arith.constant dense<0.000000e+00> : vector<8x128xf32>
    %13 = tpu.matmul %12, %11, %cst_11 {dimension_numbers = #tpu.dot_dimension_numbers<[1], [0], [0], [1], [0, 0, 1, 1], [], []>} : vector<8x48xf32>, vector<48x128xf32>, vector<8x128xf32> -> vector<8x128xf32>
    %14 = vector.extract_strided_slice %0 {offsets = [1, 0], sizes = [1, 128], strides = [1, 1]} : vector<8x128xf32> to vector<1x128xf32>
    %15 = vector.broadcast %14 : vector<1x128xf32> to vector<8x128xf32>
    %16 = arith.addf %13, %15 : vector<8x128xf32>
    %cst_12 = arith.constant 0.000000e+00 : f32
    %17 = vector.broadcast %cst_12 : f32 to vector<8x128xf32>
    %18 = arith.maximumf %16, %17 : vector<8x128xf32>
    %c320 = arith.constant 320 : index
    %c0_13 = arith.constant 0 : index
    %19 = vector.load %arg7[%c320, %c0_13] : memref<832x128xf32, #tpu.memory_space<vmem>>, vector<128x128xf32>
    %cst_14 = arith.constant dense<0.000000e+00> : vector<8x128xf32>
    %20 = tpu.matmul %18, %19, %cst_14 {dimension_numbers = #tpu.dot_dimension_numbers<[1], [0], [0], [1], [0, 0, 1, 1], [], []>} : vector<8x128xf32>, vector<128x128xf32>, vector<8x128xf32> -> vector<8x128xf32>
    %21 = arith.addf %10, %20 : vector<8x128xf32>
    %c128 = arith.constant 128 : index
    %c0_15 = arith.constant 0 : index
    %22 = vector.load %arg7[%c128, %c0_15] : memref<832x128xf32, #tpu.memory_space<vmem>>, vector<64x128xf32>
    %c0_16 = arith.constant 0 : index
    %c0_17 = arith.constant 0 : index
    %23 = vector.load %arg3[%c0_16, %c0_17] : memref<8x64xf32, #tpu.memory_space<vmem>>, vector<8x64xf32>
    %cst_18 = arith.constant dense<0.000000e+00> : vector<8x128xf32>
    %24 = tpu.matmul %23, %22, %cst_18 {dimension_numbers = #tpu.dot_dimension_numbers<[1], [0], [0], [1], [0, 0, 1, 1], [], []>} : vector<8x64xf32>, vector<64x128xf32>, vector<8x128xf32> -> vector<8x128xf32>
    %25 = vector.extract_strided_slice %0 {offsets = [2, 0], sizes = [1, 128], strides = [1, 1]} : vector<8x128xf32> to vector<1x128xf32>
    %26 = vector.broadcast %25 : vector<1x128xf32> to vector<8x128xf32>
    %27 = arith.addf %24, %26 : vector<8x128xf32>
    %cst_19 = arith.constant 0.000000e+00 : f32
    %28 = vector.broadcast %cst_19 : f32 to vector<8x128xf32>
    %29 = arith.maximumf %27, %28 : vector<8x128xf32>
    %c448 = arith.constant 448 : index
    %c0_20 = arith.constant 0 : index
    %30 = vector.load %arg7[%c448, %c0_20] : memref<832x128xf32, #tpu.memory_space<vmem>>, vector<128x128xf32>
    %cst_21 = arith.constant dense<0.000000e+00> : vector<8x128xf32>
    %31 = tpu.matmul %29, %30, %cst_21 {dimension_numbers = #tpu.dot_dimension_numbers<[1], [0], [0], [1], [0, 0, 1, 1], [], []>} : vector<8x128xf32>, vector<128x128xf32>, vector<8x128xf32> -> vector<8x128xf32>
    %32 = arith.addf %21, %31 : vector<8x128xf32>
    %33 = vector.extract_strided_slice %0 {offsets = [3, 0], sizes = [1, 128], strides = [1, 1]} : vector<8x128xf32> to vector<1x128xf32>
    %34 = vector.broadcast %33 : vector<1x128xf32> to vector<8x128xf32>
    %35 = arith.addf %32, %34 : vector<8x128xf32>
    %36 = arith.mulf %35, %35 : vector<8x128xf32>
    %cst_22 = arith.constant dense<0.000000e+00> : vector<8xf32>
    %37 = vector.multi_reduction <add>, %36, %cst_22 [1] : vector<8x128xf32> to vector<8xf32>
    %38 = vector.shape_cast %37 : vector<8xf32> to vector<8x1xf32>
    %cst_23 = arith.constant 1.000000e-24 : f32
    %39 = vector.broadcast %cst_23 : f32 to vector<8x1xf32>
    %40 = arith.maximumf %38, %39 : vector<8x1xf32>
    %41 = math.rsqrt %40 : vector<8x1xf32>
    %42 = vector.broadcast %41 : vector<8x1xf32> to vector<8x128xf32>
    %43 = arith.mulf %35, %42 : vector<8x128xf32>
    %c0_24 = arith.constant 0 : index
    %c0_25 = arith.constant 0 : index
    %44 = vector.load %arg7[%c0_24, %c0_25] : memref<832x128xf32, #tpu.memory_space<vmem>>, vector<32x128xf32>
    %c0_26 = arith.constant 0 : index
    %c0_27 = arith.constant 0 : index
    %45 = vector.load %arg4[%c0_26, %c0_27] : memref<8x32xf32, #tpu.memory_space<vmem>>, vector<8x32xf32>
    %cst_28 = arith.constant dense<0.000000e+00> : vector<8x128xf32>
    %46 = tpu.matmul %45, %44, %cst_28 {dimension_numbers = #tpu.dot_dimension_numbers<[1], [0], [0], [1], [0, 0, 1, 1], [], []>} : vector<8x32xf32>, vector<32x128xf32>, vector<8x128xf32> -> vector<8x128xf32>
    %47 = vector.extract_strided_slice %0 {offsets = [0, 0], sizes = [1, 128], strides = [1, 1]} : vector<8x128xf32> to vector<1x128xf32>
    %48 = vector.broadcast %47 : vector<1x128xf32> to vector<8x128xf32>
    %49 = arith.addf %46, %48 : vector<8x128xf32>
    %cst_29 = arith.constant 0.000000e+00 : f32
    %50 = vector.broadcast %cst_29 : f32 to vector<8x128xf32>
    %51 = arith.maximumf %49, %50 : vector<8x128xf32>
    %c192_30 = arith.constant 192 : index
    %c0_31 = arith.constant 0 : index
    %52 = vector.load %arg7[%c192_30, %c0_31] : memref<832x128xf32, #tpu.memory_space<vmem>>, vector<128x128xf32>
    %cst_32 = arith.constant dense<0.000000e+00> : vector<8x128xf32>
    %53 = tpu.matmul %51, %52, %cst_32 {dimension_numbers = #tpu.dot_dimension_numbers<[1], [0], [0], [1], [0, 0, 1, 1], [], []>} : vector<8x128xf32>, vector<128x128xf32>, vector<8x128xf32> -> vector<8x128xf32>
    %c64_33 = arith.constant 64 : index
    %c0_34 = arith.constant 0 : index
    %54 = vector.load %arg7[%c64_33, %c0_34] : memref<832x128xf32, #tpu.memory_space<vmem>>, vector<48x128xf32>
    %c0_35 = arith.constant 0 : index
    %c0_36 = arith.constant 0 : index
    %55 = vector.load %arg5[%c0_35, %c0_36] : memref<8x48xf32, #tpu.memory_space<vmem>>, vector<8x48xf32>
    %cst_37 = arith.constant dense<0.000000e+00> : vector<8x128xf32>
    %56 = tpu.matmul %55, %54, %cst_37 {dimension_numbers = #tpu.dot_dimension_numbers<[1], [0], [0], [1], [0, 0, 1, 1], [], []>} : vector<8x48xf32>, vector<48x128xf32>, vector<8x128xf32> -> vector<8x128xf32>
    %57 = vector.extract_strided_slice %0 {offsets = [1, 0], sizes = [1, 128], strides = [1, 1]} : vector<8x128xf32> to vector<1x128xf32>
    %58 = vector.broadcast %57 : vector<1x128xf32> to vector<8x128xf32>
    %59 = arith.addf %56, %58 : vector<8x128xf32>
    %cst_38 = arith.constant 0.000000e+00 : f32
    %60 = vector.broadcast %cst_38 : f32 to vector<8x128xf32>
    %61 = arith.maximumf %59, %60 : vector<8x128xf32>
    %c320_39 = arith.constant 320 : index
    %c0_40 = arith.constant 0 : index
    %62 = vector.load %arg7[%c320_39, %c0_40] : memref<832x128xf32, #tpu.memory_space<vmem>>, vector<128x128xf32>
    %cst_41 = arith.constant dense<0.000000e+00> : vector<8x128xf32>
    %63 = tpu.matmul %61, %62, %cst_41 {dimension_numbers = #tpu.dot_dimension_numbers<[1], [0], [0], [1], [0, 0, 1, 1], [], []>} : vector<8x128xf32>, vector<128x128xf32>, vector<8x128xf32> -> vector<8x128xf32>
    %64 = arith.addf %53, %63 : vector<8x128xf32>
    %c128_42 = arith.constant 128 : index
    %c0_43 = arith.constant 0 : index
    %65 = vector.load %arg7[%c128_42, %c0_43] : memref<832x128xf32, #tpu.memory_space<vmem>>, vector<64x128xf32>
    %c0_44 = arith.constant 0 : index
    %c0_45 = arith.constant 0 : index
    %66 = vector.load %arg6[%c0_44, %c0_45] : memref<8x64xf32, #tpu.memory_space<vmem>>, vector<8x64xf32>
    %cst_46 = arith.constant dense<0.000000e+00> : vector<8x128xf32>
    %67 = tpu.matmul %66, %65, %cst_46 {dimension_numbers = #tpu.dot_dimension_numbers<[1], [0], [0], [1], [0, 0, 1, 1], [], []>} : vector<8x64xf32>, vector<64x128xf32>, vector<8x128xf32> -> vector<8x128xf32>
    %68 = vector.extract_strided_slice %0 {offsets = [2, 0], sizes = [1, 128], strides = [1, 1]} : vector<8x128xf32> to vector<1x128xf32>
    %69 = vector.broadcast %68 : vector<1x128xf32> to vector<8x128xf32>
    %70 = arith.addf %67, %69 : vector<8x128xf32>
    %cst_47 = arith.constant 0.000000e+00 : f32
    %71 = vector.broadcast %cst_47 : f32 to vector<8x128xf32>
    %72 = arith.maximumf %70, %71 : vector<8x128xf32>
    %c448_48 = arith.constant 448 : index
    %c0_49 = arith.constant 0 : index
    %73 = vector.load %arg7[%c448_48, %c0_49] : memref<832x128xf32, #tpu.memory_space<vmem>>, vector<128x128xf32>
    %cst_50 = arith.constant dense<0.000000e+00> : vector<8x128xf32>
    %74 = tpu.matmul %72, %73, %cst_50 {dimension_numbers = #tpu.dot_dimension_numbers<[1], [0], [0], [1], [0, 0, 1, 1], [], []>} : vector<8x128xf32>, vector<128x128xf32>, vector<8x128xf32> -> vector<8x128xf32>
    %75 = arith.addf %64, %74 : vector<8x128xf32>
    %76 = vector.extract_strided_slice %0 {offsets = [3, 0], sizes = [1, 128], strides = [1, 1]} : vector<8x128xf32> to vector<1x128xf32>
    %77 = vector.broadcast %76 : vector<1x128xf32> to vector<8x128xf32>
    %78 = arith.addf %75, %77 : vector<8x128xf32>
    %79 = arith.mulf %78, %78 : vector<8x128xf32>
    %cst_51 = arith.constant dense<0.000000e+00> : vector<8xf32>
    %80 = vector.multi_reduction <add>, %79, %cst_51 [1] : vector<8x128xf32> to vector<8xf32>
    %81 = vector.shape_cast %80 : vector<8xf32> to vector<8x1xf32>
    %cst_52 = arith.constant 1.000000e-24 : f32
    %82 = vector.broadcast %cst_52 : f32 to vector<8x1xf32>
    %83 = arith.maximumf %81, %82 : vector<8x1xf32>
    %84 = math.rsqrt %83 : vector<8x1xf32>
    %85 = vector.broadcast %84 : vector<8x1xf32> to vector<8x128xf32>
    %86 = arith.mulf %78, %85 : vector<8x128xf32>
    %87 = arith.subf %43, %86 : vector<8x128xf32>
    %88 = math.absf %87 : vector<8x128xf32>
    %c576 = arith.constant 576 : index
    %c0_53 = arith.constant 0 : index
    %89 = vector.load %arg7[%c576, %c0_53] : memref<832x128xf32, #tpu.memory_space<vmem>>, vector<128x128xf32>
    %cst_54 = arith.constant dense<0.000000e+00> : vector<8x128xf32>
    %90 = tpu.matmul %88, %89, %cst_54 {dimension_numbers = #tpu.dot_dimension_numbers<[1], [0], [0], [1], [0, 0, 1, 1], [], []>} : vector<8x128xf32>, vector<128x128xf32>, vector<8x128xf32> -> vector<8x128xf32>
    %91 = vector.extract_strided_slice %0 {offsets = [4, 0], sizes = [1, 128], strides = [1, 1]} : vector<8x128xf32> to vector<1x128xf32>
    %92 = vector.broadcast %91 : vector<1x128xf32> to vector<8x128xf32>
    %93 = arith.addf %90, %92 : vector<8x128xf32>
    %cst_55 = arith.constant 5.000000e-01 : f32
    %94 = vector.broadcast %cst_55 : f32 to vector<8x128xf32>
    %95 = arith.mulf %93, %94 : vector<8x128xf32>
    %cst_56 = arith.constant 1.41421354 : f32
    %96 = vector.broadcast %cst_56 : f32 to vector<8x128xf32>
    %97 = arith.divf %93, %96 : vector<8x128xf32>
    %98 = math.erf %97 : vector<8x128xf32>
    %cst_57 = arith.constant 1.000000e+00 : f32
    %99 = vector.broadcast %cst_57 : f32 to vector<8x128xf32>
    %100 = arith.addf %99, %98 : vector<8x128xf32>
    %101 = arith.mulf %95, %100 : vector<8x128xf32>
    %102 = tpu.iota {dimensions = array<i32: 1>} : vector<8x128xi32>
    %c96_i32 = arith.constant 96 : i32
    %103 = vector.broadcast %c96_i32 : i32 to vector<8x128xi32>
    %104 = arith.cmpi slt, %102, %103 : vector<8x128xi32>
    %cst_58 = arith.constant dense<0.000000e+00> : vector<8xf32>
    %105 = vector.multi_reduction <add>, %101, %cst_58 [1] : vector<8x128xf32> to vector<8xf32>
    %106 = vector.shape_cast %105 : vector<8xf32> to vector<8x1xf32>
    %cst_59 = arith.constant 0.010416667 : f32
    %107 = vector.broadcast %cst_59 : f32 to vector<8x1xf32>
    %108 = arith.mulf %106, %107 : vector<8x1xf32>
    %109 = vector.broadcast %108 : vector<8x1xf32> to vector<8x128xf32>
    %110 = arith.subf %101, %109 : vector<8x128xf32>
    %cst_60 = arith.constant 0.000000e+00 : f32
    %111 = vector.broadcast %cst_60 : f32 to vector<8x128xf32>
    %112 = arith.select %104, %110, %111 : vector<8x128xi1>, vector<8x128xf32>
    %113 = arith.mulf %112, %112 : vector<8x128xf32>
    %cst_61 = arith.constant dense<0.000000e+00> : vector<8xf32>
    %114 = vector.multi_reduction <add>, %113, %cst_61 [1] : vector<8x128xf32> to vector<8xf32>
    %115 = vector.shape_cast %114 : vector<8xf32> to vector<8x1xf32>
    %cst_62 = arith.constant 0.010416667 : f32
    %116 = vector.broadcast %cst_62 : f32 to vector<8x1xf32>
    %117 = arith.mulf %115, %116 : vector<8x1xf32>
    %cst_63 = arith.constant 9.99999974E-6 : f32
    %118 = vector.broadcast %cst_63 : f32 to vector<8x1xf32>
    %119 = arith.addf %117, %118 : vector<8x1xf32>
    %120 = math.rsqrt %119 : vector<8x1xf32>
    %121 = vector.broadcast %120 : vector<8x1xf32> to vector<8x128xf32>
    %122 = arith.mulf %112, %121 : vector<8x128xf32>
    %123 = vector.extract_strided_slice %0 {offsets = [5, 0], sizes = [1, 128], strides = [1, 1]} : vector<8x128xf32> to vector<1x128xf32>
    %124 = vector.broadcast %123 : vector<1x128xf32> to vector<8x128xf32>
    %125 = arith.mulf %122, %124 : vector<8x128xf32>
    %126 = vector.extract_strided_slice %0 {offsets = [6, 0], sizes = [1, 128], strides = [1, 1]} : vector<8x128xf32> to vector<1x128xf32>
    %127 = vector.broadcast %126 : vector<1x128xf32> to vector<8x128xf32>
    %128 = arith.addf %125, %127 : vector<8x128xf32>
    %c704 = arith.constant 704 : index
    %c0_64 = arith.constant 0 : index
    %129 = vector.load %arg7[%c704, %c0_64] : memref<832x128xf32, #tpu.memory_space<vmem>>, vector<128x128xf32>
    %cst_65 = arith.constant dense<0.000000e+00> : vector<8x128xf32>
    %130 = tpu.matmul %128, %129, %cst_65 {dimension_numbers = #tpu.dot_dimension_numbers<[1], [0], [0], [1], [0, 0, 1, 1], [], []>} : vector<8x128xf32>, vector<128x128xf32>, vector<8x128xf32> -> vector<8x128xf32>
    %131 = vector.extract_strided_slice %0 {offsets = [7, 0], sizes = [1, 128], strides = [1, 1]} : vector<8x128xf32> to vector<1x128xf32>
    %132 = vector.broadcast %131 : vector<1x128xf32> to vector<8x128xf32>
    %133 = arith.addf %130, %132 : vector<8x128xf32>
    %c0_66 = arith.constant 0 : index
    %c0_67 = arith.constant 0 : index
    %134 = vector.load %arg9[%c0_66, %c0_67] : memref<8x128xf32, #tpu.memory_space<vmem>>, vector<8x128xf32>
    tpu.vector_store %arg9[%c0_66, %c0_67], %133 {strides = array<i32>} : memref<8x128xf32, #tpu.memory_space<vmem>>, vector<8x128xf32>,
    return
  }
  func.func @transform_0(%arg0: i32) -> (i32, i32) {
    %c0_i32 = arith.constant 0 : i32
    %c0_i32_0 = arith.constant 0 : i32
    return %arg0, %c0_i32 : i32, i32
  }
  func.func @transform_1(%arg0: i32) -> (i32, i32) {
    %c0_i32 = arith.constant 0 : i32
    %c0_i32_0 = arith.constant 0 : i32
    return %arg0, %c0_i32 : i32, i32
  }
  func.func @transform_2(%arg0: i32) -> (i32, i32) {
    %c0_i32 = arith.constant 0 : i32
    %c0_i32_0 = arith.constant 0 : i32
    return %arg0, %c0_i32 : i32, i32
  }
  func.func @transform_3(%arg0: i32) -> (i32, i32) {
    %c0_i32 = arith.constant 0 : i32
    %c0_i32_0 = arith.constant 0 : i32
    return %arg0, %c0_i32 : i32, i32
  }
  func.func @transform_4(%arg0: i32) -> (i32, i32) {
    %c0_i32 = arith.constant 0 : i32
    %c0_i32_0 = arith.constant 0 : i32
    return %arg0, %c0_i32 : i32, i32
  }
  func.func @transform_5(%arg0: i32) -> (i32, i32) {
    %c0_i32 = arith.constant 0 : i32
    %c0_i32_0 = arith.constant 0 : i32
    return %arg0, %c0_i32 : i32, i32
  }
  func.func @transform_6(%arg0: i32) -> (i32, i32) {
    %c0_i32 = arith.constant 0 : i32
    %c0_i32_0 = arith.constant 0 : i32
    %c0_i32_1 = arith.constant 0 : i32
    return %c0_i32, %c0_i32_0 : i32, i32
  }
  func.func @transform_7(%arg0: i32) -> (i32, i32) {
    %c0_i32 = arith.constant 0 : i32
    %c0_i32_0 = arith.constant 0 : i32
    %c0_i32_1 = arith.constant 0 : i32
    return %c0_i32, %c0_i32_0 : i32, i32
  }
  func.func @transform_8(%arg0: i32) -> (i32, i32) {
    %c0_i32 = arith.constant 0 : i32
    %c0_i32_0 = arith.constant 0 : i32
    return %arg0, %c0_i32 : i32, i32
  }
}

</mosaic_0001>

<bundles_post_ra>
// kernel: tpu_custom_call.1
= control target key start
LH: loop header
LB: loop body
LE: loop exit
PB: predicated region body
PF: predicated region fallthrough
CT: control target
= control target key end

     0   :  { %13 = vsyncpa [#allocation3], 0  ;;  %s2649_s0 = inlined_call_operand.hbm [shape: f32[8,32], index: 0, kind: input, shape index: {}]   ;;  %s2650_s1 = inlined_call_operand.hbm [shape: f32[8,48], index: 1, kind: input, shape index: {}]   ;;  %s2651_s2 = inlined_call_operand.hbm [shape: f32[8,64], index: 2, kind: input, shape index: {}]   ;;  %s2652_s3 = inlined_call_operand.hbm [shape: f32[8,32], index: 3, kind: input, shape index: {}]   ;;  %s2653_s4 = inlined_call_operand.hbm [shape: f32[8,48], index: 4, kind: input, shape index: {}]   ;;  %s2654_s5 = inlined_call_operand.vmem [shape: f32[8,64], index: 5, kind: input, shape index: {}]   ;;  %s2655_s6 = inlined_call_operand.hbm [shape: f32[832,128], index: 6, kind: input, shape index: {}]   ;;  %s2656_s7 = inlined_call_operand.hbm [shape: f32[8,128], index: 7, kind: input, shape index: {}]   ;;  %s2657_s8 = inlined_call_operand.hbm [shape: f32[8,128], index: 8, kind: output, shape index: {}]  }
   0x1   :  { %14 = vsyncpa [#allocation6], 0 }
   0x2   :  { %15 = vsyncpa [#allocation9], 0 }
   0x3   :  { %16 = vsyncpa [#allocation12], 0 }
   0x4   :  { %17 = vsyncpa [#allocation4], 0  ;;  %s2061_s27 = smov [#allocation5]   ;;  %s2062_s29 = smov [#allocation8]  }
   0x5   :  { %s34_s28 = sshll.u32 %s2061_s27, 4  ;;  %s54_s30 = sshll.u32 %s2062_s29, 4  ;;  %s35_s28 = int_to_ptr.vmem [resolvable:$true] %s34_s28  ;;  %s55_s30 = int_to_ptr.vmem [resolvable:$true] %s54_s30 }
   0x6   :  { %s1899_s9 = scalar_lea.vmem %s35_s28, 128  ;;  %p1904_p1 = scmp.lt.s32.totalorder %s35_s28, %s35_s28 }
   0x7   :  { %p1900_p0 = scmp.ne.s32.totalorder %s35_s28, %s1899_s9  ;;  %p1905_p2 = scmp.lt.s32.totalorder %s1899_s9, %s1899_s9 }
   0x9   :  { %p1906_p3 = por %p1905_p2, %p1904_p1 }
   0xb   :  { %p1907_p4 = pnand %p1906_p3, %p1900_p0 }
   0xd   :  { %1910 = shalt.err (!%p1907_p4)
}
   0xe   :  { %37 = dma.hbm_to_vmem [thread:$0]  %s2650_s1, 128, %s35_s28, [#allocation6]  }
   0xf   :  { %s1919_s12 = scalar_lea.vmem %s55_s30, 128  ;;  %p1924_p6 = scmp.lt.s32.totalorder %s55_s30, %s55_s30 }
  0x10   :  { %p1920_p5 = scmp.ne.s32.totalorder %s55_s30, %s1919_s12  ;;  %p1925_p7 = scmp.lt.s32.totalorder %s1919_s12, %s1919_s12 }
  0x12   :  { %p1926_p8 = por %p1925_p7, %p1924_p6 }
  0x14   :  { %p1927_p9 = pnand %p1926_p8, %p1920_p5 }
  0x16   :  { %1930 = shalt.err (!%p1927_p9)
}
  0x17   :  { %57 = dma.hbm_to_vmem [thread:$0]  %s2652_s3, 128, %s55_s30, [#allocation9]  }
  0x18   :  { %s2063_s15 = smov [#allocation11]  }
  0x19   :  { %s75_s16 = sshll.u32 %s2063_s15, 4  ;;  %s76_s16 = int_to_ptr.vmem [resolvable:$true] %s75_s16 }
  0x1a   :  { %s1939_s17 = scalar_lea.vmem %s76_s16, 13312  ;;  %p1944_p11 = scmp.lt.s32.totalorder %s76_s16, %s76_s16 }
  0x1b   :  { %p1940_p10 = scmp.ne.s32.totalorder %s76_s16, %s1939_s17  ;;  %p1945_p12 = scmp.lt.s32.totalorder %s1939_s17, %s1939_s17 }
  0x1d   :  { %p1946_p13 = por %p1945_p12, %p1944_p11 }
  0x1f   :  { %p1947_p0 = pnand %p1946_p13, %p1940_p10 }
  0x21   :  { %1950 = shalt.err (!%p1947_p0)
}
  0x22   :  { %s2064_s1 = smov 128   ;;  %s2065_s18 = smov 8  }
  0x23   :  { %81 = dma.hbm_to_vmem [thread:$0]  %s2655_s6, 13312, %s76_s16, [#allocation12], %s2064_s1, %s2064_s1, %s2065_s18  }
  0x24   :  { %s2066_s21 = smov [#allocation2]   ;;  %s2067_s3 = smov [#allocation7]  }
  0x25   :  { %s24_s22 = sshll.u32 %s2066_s21, 4  ;;  %s44_s23 = sshll.u32 %s2067_s3, 4  ;;  %s25_s22 = int_to_ptr.vmem [resolvable:$true] %s24_s22  ;;  %s45_s23 = int_to_ptr.vmem [resolvable:$true] %s44_s23 }
  0x26   :  { %s1959_s24 = scalar_lea.vmem %s25_s22, 128  ;;  %p1964_p2 = scmp.lt.s32.totalorder %s25_s22, %s25_s22 }
  0x27   :  { %p1960_p1 = scmp.ne.s32.totalorder %s25_s22, %s1959_s24  ;;  %p1965_p3 = scmp.lt.s32.totalorder %s1959_s24, %s1959_s24 }
  0x29   :  { %p1966_p4 = por %p1965_p3, %p1964_p2 }
  0x2b   :  { %p1967_p5 = pnand %p1966_p4, %p1960_p1 }
  0x2d   :  { %1970 = shalt.err (!%p1967_p5)
}
  0x2e   :  { %27 = dma.hbm_to_vmem [thread:$0]  %s2649_s0, 128, %s25_s22, [#allocation3]  }
  0x2f   :  { %s1979_s27 = scalar_lea.vmem %s45_s23, 128  ;;  %p1984_p7 = scmp.lt.s32.totalorder %s45_s23, %s45_s23 }
  0x30   :  { %p1980_p6 = scmp.ne.s32.totalorder %s45_s23, %s1979_s27  ;;  %p1985_p8 = scmp.lt.s32.totalorder %s1979_s27, %s1979_s27 }
  0x32   :  { %p1986_p9 = por %p1985_p8, %p1984_p7 }
  0x34   :  { %p1987_p10 = pnand %p1986_p9, %p1980_p6 }
  0x36   :  { %1990 = shalt.err (!%p1987_p10)
}
  0x37   :  { %47 = dma.hbm_to_vmem [thread:$0]  %s2651_s2, 128, %s45_s23, [#allocation6]  }
  0x38   :  { %s2068_s29 = smov [#allocation10]   ;;  %s2069_s9 = smov [#allocation13]  }
  0x39   :  { %s64_s30 = sshll.u32 %s2068_s29, 4  ;;  %s88_s10 = sshll.u32 %s2069_s9, 4  ;;  %s65_s30 = int_to_ptr.vmem [resolvable:$true] %s64_s30  ;;  %s89_s10 = int_to_ptr.vmem [resolvable:$true] %s88_s10 }
  0x3a   :  { %s1999_s11 = scalar_lea.vmem %s65_s30, 128  ;;  %p2004_p12 = scmp.lt.s32.totalorder %s65_s30, %s65_s30 }
  0x3b   :  { %p2000_p11 = scmp.ne.s32.totalorder %s65_s30, %s1999_s11  ;;  %p2005_p13 = scmp.lt.s32.totalorder %s1999_s11, %s1999_s11 }
  0x3d   :  { %p2006_p0 = por %p2005_p13, %p2004_p12 }
  0x3f   :  { %p2007_p1 = pnand %p2006_p0, %p2000_p11 }
  0x41   :  { %2010 = shalt.err (!%p2007_p1)
}
  0x42   :  { %67 = dma.hbm_to_vmem [thread:$0]  %s2653_s4, 128, %s65_s30, [#allocation9]  }
  0x43   :  { %s2019_s13 = scalar_lea.vmem %s89_s10, 128  ;;  %p2024_p3 = scmp.lt.s32.totalorder %s89_s10, %s89_s10 }
  0x44   :  { %p2020_p2 = scmp.ne.s32.totalorder %s89_s10, %s2019_s13  ;;  %p2025_p4 = scmp.lt.s32.totalorder %s2019_s13, %s2019_s13 }
  0x46   :  { %p2026_p5 = por %p2025_p4, %p2024_p3 }
  0x48   :  { %p2027_p6 = pnand %p2026_p5, %p2020_p2 }
  0x4a   :  { %2030 = shalt.err (!%p2027_p6)
}
  0x4b   :  { %91 = dma.hbm_to_vmem [thread:$0]  %s2656_s7, 128, %s89_s10, [#allocation12]  }
  0x4c   :  { %2051 = dma.done.wait [#allocation3], 128  }
  0x4d   :  { %2052 = vsyncadd [#allocation3], 4294967168 }
  0x4e   :  { %2053 = dma.done.wait [#allocation6], 256  }
  0x4f   :  { %2054 = vsyncadd [#allocation6], 4294967040 }
  0x50   :  { %2055 = dma.done.wait [#allocation9], 256  }
  0x51   :  { %2056 = vsyncadd [#allocation9], 4294967040 }
  0x52   :  { %2057 = dma.done.wait [#allocation12], 13440  }
  0x53   :  { %2058 = vsyncadd [#allocation12], 4294953856  ;;  %v2070_v0 = vmov 0.0   ;;  %vm2071_vm0 = vmmov 0   ;;  %v2145_v1 = vld [vmem:[#allocation11 + $0x18] sm:$0xff]  ;;  %v2147_v2 = vld [vmem:[#allocation11 + $0x10] sm:$0xff]  ;;  %v119_v45 = vlaneseq }
  0x54   :  { %1501 = vmatprep.subr.mxu0 %v2070_v0  ;;  %1509 = vmatprep.mubr.msk.f32.mxu0 %vm2071_vm0, %v2070_v0  ;;  %v2151_v3 = vld [vmem:[#allocation11 + $0x8] sm:$0xff]  ;;  %v2155_v4 = vld [vmem:[#allocation11] sm:$0xff]  ;;  %v2157_v5 = vld [vmem:[#allocation11 + $0x138] sm:$0xff]  ;;  %vm123_vm1 = vcmask 261120   ;;  %vm225_vm2 = vcmask 392192   ;;  %vm469_vm3 = vcmask 523264  }
  0x55   :  { %1562 = vmatprep.subr.mxu1 %v2070_v0  ;;  %1594 = vmatprep.mubr.msk.f32.mxu1 %vm2071_vm0, %v2070_v0  ;;  %v2159_v6 = vld [vmem:[#allocation11 + $0x130] sm:$0xff]  ;;  %v118_v7 = vld [vmem:[#allocation2] sm:$0xff]  ;;  %v2164_v8 = vld [vmem:[#allocation11 + $0x68] sm:$0xff]  ;;  %v2320_v46 = vshrl.u32 %v119_v45, 7 }
  0x56   :  { %1502 = vmatpush3.msra.mxu0 %v2145_v1  ;;  %1563 = vmatpush3.msra.mxu1 %v2157_v5  ;;  %v2171_v9 = vld [vmem:[#allocation11 + $0x60] sm:$0xff]  ;;  %v2173_v10 = vld [vmem:[#allocation11 + $0x128] sm:$0xff]  ;;  %v2179_v11 = vld [vmem:[#allocation11 + $0x58] sm:$0xff] }
  0x57   :  { %1503 = vmatprep.subr.mxu0 %v2070_v0  ;;  %1564 = vmatprep.subr.mxu1 %v2070_v0  ;;  %v2182_v12 = vld [vmem:[#allocation11 + $0x120] sm:$0xff]  ;;  %v2187_v13 = vld [vmem:[#allocation11 + $0x50] sm:$0xff]  ;;  %v2190_v14 = vld [vmem:[#allocation11 + $0x118] sm:$0xff]  ;;  %v121_v47 = vsub.s32 0, %v2320_v46  ;;  %v223_v54 = vsub.s32 1, %v2320_v46 }
  0x58   :  { %1504 = vmatpush3.msra.mxu0 %v2147_v2  ;;  %1565 = vmatpush3.msra.mxu1 %v2159_v6  ;;  %v2195_v15 = vld [vmem:[#allocation11 + $0x48] sm:$0xff]  ;;  %v2198_v16 = vld [vmem:[#allocation11 + $0x110] sm:$0xff]  ;;  %v2203_v17 = vld [vmem:[#allocation11 + $0x40] sm:$0xff] }
  0x59   :  { %1505 = vmatprep.subr.mxu0 %v2070_v0  ;;  %1566 = vmatprep.subr.mxu1 %v2070_v0  ;;  %v2206_v18 = vld [vmem:[#allocation11 + $0x108] sm:$0xff]  ;;  %v220_v19 = vld [vmem:[#allocation5] sm:$0xff]  ;;  %v2211_v20 = vld [vmem:[#allocation11 + $0x1b8] sm:$0xff] }
  0x5a   :  { %1506 = vmatpush3.msra.mxu0 %v2151_v3  ;;  %1567 = vmatpush3.msra.mxu1 %v2173_v10  ;;  %v2216_v21 = vld [vmem:[#allocation11 + $0x100] sm:$0xff]  ;;  %v2220_v22 = vld [vmem:[#allocation11 + $0x1b0] sm:$0xff]  ;;  %v2224_v23 = vld [vmem:[#allocation11 + $0xf8] sm:$0xff] }
  0x5b   :  { %1507 = vmatprep.subr.mxu0 %v2070_v0  ;;  %1568 = vmatprep.subr.mxu1 %v2070_v0  ;;  %v2228_v24 = vld [vmem:[#allocation11 + $0x1a8] sm:$0xff]  ;;  %v2232_v25 = vld [vmem:[#allocation11 + $0xf0] sm:$0xff]  ;;  %v2236_v26 = vld [vmem:[#allocation11 + $0x1a0] sm:$0xff] }
  0x5c   :  { %1508 = vmatpush3.msra.mxu0 %v2155_v4  ;;  %1569 = vmatpush3.msra.mxu1 %v2182_v12  ;;  %v2240_v27 = vld [vmem:[#allocation11 + $0xe8] sm:$0xff]  ;;  %v2244_v28 = vld [vmem:[#allocation11 + $0x198] sm:$0xff]  ;;  %v2248_v29 = vld [vmem:[#allocation11 + $0xe0] sm:$0xff] }
  0x5d   :  { %1510 = vmatmul.mubr.msk.f32.vlgmr.msra.gmra.mxu0 %vm123_vm1, %v118_v7  ;;  %1512 = vmatprep.subr.mxu0 %v2070_v0  ;;  %v2252_v30 = vld [vmem:[#allocation11 + $0x190] sm:$0xff]  ;;  %v2256_v31 = vld [vmem:[#allocation11 + $0xd8] sm:$0xff]  ;;  %v2260_v32 = vld [vmem:[#allocation11 + $0x188] sm:$0xff] }
  0x5e   :  { %1513 = vmatpush3.msra.mxu0 %v2164_v8  ;;  %1524 = vmatprep.mubr.msk.f32.mxu0 %vm2071_vm0, %v2070_v0  ;;  %v2266_v33 = vld [vmem:[#allocation11 + $0x180] sm:$0xff]  ;;  %v2275_v34 = vld [vmem:[#allocation11 + $0xd0] sm:$0xff]  ;;  %v2278_v35 = vld [vmem:[#allocation11 + $0x178] sm:$0xff] }
  0x5f   :  { %1514 = vmatprep.subr.mxu0 %v2070_v0  ;;  %1570 = vmatprep.subr.mxu1 %v2070_v0  ;;  %v2282_v36 = vld [vmem:[#allocation11 + $0xc8] sm:$0xff]  ;;  %v2286_v37 = vld [vmem:[#allocation11 + $0x170] sm:$0xff]  ;;  %v2290_v38 = vld [vmem:[#allocation11 + $0xc0] sm:$0xff] }
  0x60   :  { %1515 = vmatpush3.msra.mxu0 %v2171_v9  ;;  %1571 = vmatpush3.msra.mxu1 %v2190_v14  ;;  %v2292_v39 = vld [vmem:[#allocation11 + $0x168] sm:$0xff]  ;;  %v2297_v40 = vld [vmem:[#allocation11 + $0x160] sm:$0xff]  ;;  %v2301_v41 = vld [vmem:[#allocation11 + $0x158] sm:$0xff] }
  0x61   :  { %1516 = vmatprep.subr.mxu0 %v2070_v0  ;;  %1572 = vmatprep.subr.mxu1 %v2070_v0  ;;  %v2305_v42 = vld [vmem:[#allocation11 + $0x150] sm:$0xff]  ;;  %v2311_v43 = vld [vmem:[#allocation11 + $0x148] sm:$0xff]  ;;  %v2315_v44 = vld [vmem:[#allocation11 + $0x140] sm:$0xff] }
  0x62   :  { %1517 = vmatpush3.msra.mxu0 %v2179_v11  ;;  %1573 = vmatpush3.msra.mxu1 %v2198_v16  ;;  %v2323_v48 = vld [vmem:[#allocation13] sm:$0xff]  ;;  %v2336_v60 = vld [vmem:[#allocation11 + $0xb8] sm:$0xff]  ;;  %v2338_v61 = vld [vmem:[#allocation11 + $0xb0] sm:$0xff] }
  0x63   :  { %1518 = vmatprep.subr.mxu0 %v2070_v0  ;;  %1574 = vmatprep.subr.mxu1 %v2070_v0  ;;  %v2326_v49 = vrot.slane %v2323_v48, %v121_v47  ;;  %v2333_v55 = vrot.slane %v2323_v48, %v223_v54  ;;  %v2344_v62 = vld [vmem:[#allocation11 + $0xa8] sm:$0xff]  ;;  %v2348_v63 = vld [vmem:[#allocation11 + $0xa0] sm:$0xff]  ;;  %v2352_v7 = vld [vmem:[#allocation11 + $0x98] sm:$0xff] }
  0x64   :  { %1519 = vmatpush3.msra.mxu0 %v2187_v13  ;;  %1575 = vmatpush3.msra.mxu1 %v2206_v18  ;;  %v2360_v47 = vld [vmem:[#allocation11 + $0x88] sm:$0xff] }
  0x65   :  { %1520 = vmatprep.subr.mxu0 %v2070_v0  ;;  %1576 = vmatprep.subr.mxu1 %v2070_v0 }
  0x66   :  { %1521 = vmatpush3.msra.mxu0 %v2195_v15  ;;  %1577 = vmatpush3.msra.mxu1 %v2216_v21 }
  0x67   :  { %1522 = vmatprep.subr.mxu0 %v2070_v0  ;;  %1578 = vmatprep.subr.mxu1 %v2070_v0 }
  0x68   :  { %1523 = vmatpush3.msra.mxu0 %v2203_v17  ;;  %1579 = vmatpush3.msra.mxu1 %v2224_v23 }
  0x69   :  { %1525 = vmatmul.mubr.msk.f32.vlgmr.msra.gmra.mxu0 %vm225_vm2, %v220_v19  ;;  %1527 = vmatprep.subr.mxu0 %v2070_v0  ;;  %v2356_v19 = vld [vmem:[#allocation11 + $0x90] sm:$0xff] }
  0x6a   :  { %1528 = vmatpush3.msra.mxu0 %v2211_v20  ;;  %1580 = vmatprep.subr.mxu1 %v2070_v0 }
  0x6b   :  { %1529 = vmatprep.subr.mxu0 %v2070_v0  ;;  %1581 = vmatpush3.msra.mxu1 %v2232_v25 }
  0x6c   :  { %1530 = vmatpush3.msra.mxu0 %v2220_v22  ;;  %1582 = vmatprep.subr.mxu1 %v2070_v0 }
  0x6d   :  { %1531 = vmatprep.subr.mxu0 %v2070_v0  ;;  %1583 = vmatpush3.msra.mxu1 %v2240_v27 }
  0x6e   :  { %1532 = vmatpush3.msra.mxu0 %v2228_v24  ;;  %1584 = vmatprep.subr.mxu1 %v2070_v0 }
  0x6f   :  { %1533 = vmatprep.subr.mxu0 %v2070_v0  ;;  %1585 = vmatpush3.msra.mxu1 %v2248_v29 }
  0x70   :  { %1534 = vmatpush3.msra.mxu0 %v2236_v26  ;;  %1586 = vmatprep.subr.mxu1 %v2070_v0 }
  0x71   :  { %1535 = vmatprep.subr.mxu0 %v2070_v0  ;;  %1587 = vmatpush3.msra.mxu1 %v2256_v31 }
  0x72   :  { %1536 = vmatpush3.msra.mxu0 %v2244_v28  ;;  %1588 = vmatprep.subr.mxu1 %v2070_v0 }
  0x73   :  { %1537 = vmatprep.subr.mxu0 %v2070_v0  ;;  %1559 = vmatprep.mubr.msk.f32.mxu0 %vm2071_vm0, %v2070_v0 }
  0x74   :  { %1538 = vmatpush3.msra.mxu0 %v2252_v30  ;;  %1589 = vmatpush3.msra.mxu1 %v2275_v34 }
  0x75   :  { %1539 = vmatprep.subr.mxu0 %v2070_v0  ;;  %1590 = vmatprep.subr.mxu1 %v2070_v0 }
  0x76   :  { %1540 = vmatpush3.msra.mxu0 %v2260_v32  ;;  %1591 = vmatpush3.msra.mxu1 %v2282_v36 }
  0x77   :  { %1541 = vmatprep.subr.mxu0 %v2070_v0  ;;  %1592 = vmatprep.subr.mxu1 %v2070_v0 }
  0x78   :  { %1542 = vmatpush3.msra.mxu0 %v2266_v33  ;;  %1593 = vmatpush3.msra.mxu1 %v2290_v38 }
  0x79   :  { %1543 = vmatprep.subr.mxu0 %v2070_v0  ;;  %1616 = vmatprep.subr.mxu1 %v2070_v0 }
  0x7a   :  { %1544 = vmatpush3.msra.mxu0 %v2278_v35 }
  0x7b   :  { %1545 = vmatprep.subr.mxu0 %v2070_v0 }
  0x7c   :  { %1546 = vmatpush3.msra.mxu0 %v2286_v37 }
  0x7d   :  { %1547 = vmatprep.subr.mxu0 %v2070_v0 }
  0x7e   :  { %1548 = vmatpush3.msra.mxu0 %v2292_v39 }
  0x7f   :  { %1549 = vmatprep.subr.mxu0 %v2070_v0 }
  0x80   :  { %1550 = vmatpush3.msra.mxu0 %v2297_v40 }
  0x81   :  { %1551 = vmatprep.subr.mxu0 %v2070_v0 }
  0x82   :  { %1552 = vmatpush3.msra.mxu0 %v2301_v41 }
  0x83   :  { %1553 = vmatprep.subr.mxu0 %v2070_v0 }
  0x84   :  { %1554 = vmatpush3.msra.mxu0 %v2305_v42 }
  0x85   :  { %1555 = vmatprep.subr.mxu0 %v2070_v0 }
  0x86   :  { %1556 = vmatpush3.msra.mxu0 %v2311_v43 }
  0x87   :  { %1557 = vmatprep.subr.mxu0 %v2070_v0 }
  0x88   :  { %1558 = vmatpush3.msra.mxu0 %v2315_v44 }
  0x89   :  { %1597 = vmatprep.subr.mxu0 %v2070_v0 }
 0x11d   :  { %v193_v50 = vpop.f32.mrf.mxu0 }
 0x11e   :  { %v194_v51 = vadd.f32 %v193_v50, %v2326_v49  ;;  %v2364_v50 = vld [vmem:[#allocation11 + $0x80] sm:$0xff] }
 0x11f   :  { %v1511_v52 = vpop.f32.mrf.mxu0 }
 0x120   :  { %v197_v53 = vmax.f32 %v194_v51, 0.0  ;;  %v464_v51 = vld [vmem:[#allocation7] sm:$0xff]  ;;  %v642_v52 = vld [vmem:[#allocation8] sm:$0xff] }
 0x122   :  { %1595 = vmatmul.mubr.f32.vlgmr.msra.gmra.mxu1 %v197_v53 }
 0x123   :  { %1648 = vmatprep.mubr.msk.f32.mxu1 %vm2071_vm0, %v2070_v0 }
 0x129   :  { %v295_v56 = vpop.f32.mrf.mxu0 }
 0x12a   :  { %v296_v57 = vadd.f32 %v295_v56, %v2333_v55 }
 0x12b   :  { %v1526_v58 = vpop.f32.mrf.mxu0 }
 0x12c   :  { %v299_v59 = vmax.f32 %v296_v57, 0.0 }
 0x12e   :  { %1560 = vmatmul.mubr.f32.vlgmr.msra.gmra.mxu0 %v299_v59 }
 0x12f   :  { %1598 = vmatpush3.msra.mxu0 %v2336_v60  ;;  %1613 = vmatprep.mubr.msk.f32.mxu0 %vm2071_vm0, %v2070_v0 }
 0x130   :  { %1599 = vmatprep.subr.mxu0 %v2070_v0 }
 0x131   :  { %1600 = vmatpush3.msra.mxu0 %v2338_v61 }
 0x132   :  { %1601 = vmatprep.subr.mxu0 %v2070_v0 }
 0x133   :  { %1602 = vmatpush3.msra.mxu0 %v2344_v62 }
 0x134   :  { %1603 = vmatprep.subr.mxu0 %v2070_v0 }
 0x135   :  { %1604 = vmatpush3.msra.mxu0 %v2348_v63 }
 0x136   :  { %1605 = vmatprep.subr.mxu0 %v2070_v0 }
 0x137   :  { %1606 = vmatpush3.msra.mxu0 %v2352_v7 }
 0x138   :  { %1607 = vmatprep.subr.mxu0 %v2070_v0 }
 0x139   :  { %1608 = vmatpush3.msra.mxu0 %v2356_v19 }
 0x13a   :  { %1609 = vmatprep.subr.mxu0 %v2070_v0 }
 0x13b   :  { %1610 = vmatpush3.msra.mxu0 %v2360_v47 }
 0x13c   :  { %1611 = vmatprep.subr.mxu0 %v2070_v0 }
 0x13d   :  { %1612 = vmatpush3.msra.mxu0 %v2364_v50 }
 0x13e   :  { %1614 = vmatmul.mubr.msk.f32.vlgmr.msra.gmra.mxu0 %vm469_vm3, %v464_v51  ;;  %1651 = vmatprep.subr.mxu0 %v2070_v0 }
 0x13f   :  { %1652 = vmatpush3.msra.mxu0 %v2145_v1  ;;  %1659 = vmatprep.mubr.msk.f32.mxu0 %vm2071_vm0, %v2070_v0  ;;  %v717_v1 = vld [vmem:[#allocation10] sm:$0xff] }
 0x140   :  { %1653 = vmatprep.subr.mxu0 %v2070_v0 }
 0x141   :  { %1654 = vmatpush3.msra.mxu0 %v2147_v2  ;;  %v2414_v2 = vld [vmem:[#allocation11 + $0x238] sm:$0xff] }
 0x142   :  { %1655 = vmatprep.subr.mxu0 %v2070_v0  ;;  %1617 = vmatpush3.msra.mxu1 %v2414_v2 }
 0x143   :  { %1656 = vmatpush3.msra.mxu0 %v2151_v3  ;;  %1618 = vmatprep.subr.mxu1 %v2070_v0  ;;  %v2420_v3 = vld [vmem:[#allocation11 + $0x230] sm:$0xff] }
 0x144   :  { %1657 = vmatprep.subr.mxu0 %v2070_v0  ;;  %1619 = vmatpush3.msra.mxu1 %v2420_v3 }
 0x145   :  { %1658 = vmatpush3.msra.mxu0 %v2155_v4  ;;  %v2422_v4 = vld [vmem:[#allocation11 + $0x228] sm:$0xff]  ;;  %1620 = vmatprep.subr.mxu1 %v2070_v0 }
 0x146   :  { %1660 = vmatmul.mubr.msk.f32.vlgmr.msra.gmra.mxu0 %vm123_vm1, %v642_v52  ;;  %1662 = vmatprep.subr.mxu0 %v2070_v0 }
 0x147   :  { %1663 = vmatpush3.msra.mxu0 %v2164_v8  ;;  %1674 = vmatprep.mubr.msk.f32.mxu0 %vm2071_vm0, %v2070_v0  ;;  %v2428_v8 = vld [vmem:[#allocation11 + $0x220] sm:$0xff] }
 0x148   :  { %1664 = vmatprep.subr.mxu0 %v2070_v0  ;;  %1621 = vmatpush3.msra.mxu1 %v2422_v4 }
 0x149   :  { %1665 = vmatpush3.msra.mxu0 %v2171_v9  ;;  %1622 = vmatprep.subr.mxu1 %v2070_v0  ;;  %v2434_v9 = vld [vmem:[#allocation11 + $0x218] sm:$0xff] }
 0x14a   :  { %1666 = vmatprep.subr.mxu0 %v2070_v0  ;;  %1623 = vmatpush3.msra.mxu1 %v2428_v8 }
 0x14b   :  { %1667 = vmatpush3.msra.mxu0 %v2179_v11  ;;  %1624 = vmatprep.subr.mxu1 %v2070_v0  ;;  %v2440_v11 = vld [vmem:[#allocation11 + $0x210] sm:$0xff] }
 0x14c   :  { %1668 = vmatprep.subr.mxu0 %v2070_v0  ;;  %1625 = vmatpush3.msra.mxu1 %v2434_v9 }
 0x14d   :  { %1669 = vmatpush3.msra.mxu0 %v2187_v13  ;;  %1626 = vmatprep.subr.mxu1 %v2070_v0  ;;  %v2450_v13 = vld [vmem:[#allocation11 + $0x208] sm:$0xff] }
 0x14e   :  { %1670 = vmatprep.subr.mxu0 %v2070_v0  ;;  %1627 = vmatpush3.msra.mxu1 %v2440_v11 }
 0x14f   :  { %1671 = vmatpush3.msra.mxu0 %v2195_v15  ;;  %1628 = vmatprep.subr.mxu1 %v2070_v0  ;;  %v2456_v15 = vld [vmem:[#allocation11 + $0x200] sm:$0xff] }
 0x150   :  { %1672 = vmatprep.subr.mxu0 %v2070_v0  ;;  %1629 = vmatpush3.msra.mxu1 %v2450_v13 }
 0x151   :  { %1673 = vmatpush3.msra.mxu0 %v2203_v17  ;;  %1630 = vmatprep.subr.mxu1 %v2070_v0  ;;  %v2458_v17 = vld [vmem:[#allocation11 + $0x1f8] sm:$0xff] }
 0x152   :  { %1675 = vmatmul.mubr.msk.f32.vlgmr.msra.gmra.mxu0 %vm225_vm2, %v717_v1  ;;  %1677 = vmatprep.subr.mxu0 %v2070_v0 }
 0x153   :  { %1678 = vmatpush3.msra.mxu0 %v2211_v20  ;;  %1709 = vmatprep.mubr.msk.f32.mxu0 %vm2071_vm0, %v2070_v0  ;;  %v2464_v20 = vld [vmem:[#allocation11 + $0x1f0] sm:$0xff] }
 0x154   :  { %1679 = vmatprep.subr.mxu0 %v2070_v0  ;;  %1631 = vmatpush3.msra.mxu1 %v2456_v15 }
 0x155   :  { %1680 = vmatpush3.msra.mxu0 %v2220_v22  ;;  %1632 = vmatprep.subr.mxu1 %v2070_v0  ;;  %v2469_v22 = vld [vmem:[#allocation11 + $0x1e8] sm:$0xff] }
 0x156   :  { %1681 = vmatprep.subr.mxu0 %v2070_v0  ;;  %1633 = vmatpush3.msra.mxu1 %v2458_v17 }
 0x157   :  { %1682 = vmatpush3.msra.mxu0 %v2228_v24  ;;  %1634 = vmatprep.subr.mxu1 %v2070_v0  ;;  %v2473_v24 = vld [vmem:[#allocation11 + $0x1e0] sm:$0xff] }
 0x158   :  { %1683 = vmatprep.subr.mxu0 %v2070_v0  ;;  %1635 = vmatpush3.msra.mxu1 %v2464_v20 }
 0x159   :  { %1684 = vmatpush3.msra.mxu0 %v2236_v26  ;;  %1636 = vmatprep.subr.mxu1 %v2070_v0  ;;  %v2477_v26 = vld [vmem:[#allocation11 + $0x1d8] sm:$0xff] }
 0x15a   :  { %1685 = vmatprep.subr.mxu0 %v2070_v0  ;;  %1637 = vmatpush3.msra.mxu1 %v2469_v22 }
 0x15b   :  { %1686 = vmatpush3.msra.mxu0 %v2244_v28  ;;  %1638 = vmatprep.subr.mxu1 %v2070_v0  ;;  %v2481_v28 = vld [vmem:[#allocation11 + $0x1d0] sm:$0xff] }
 0x15c   :  { %1687 = vmatprep.subr.mxu0 %v2070_v0  ;;  %1639 = vmatpush3.msra.mxu1 %v2473_v24 }
 0x15d   :  { %1688 = vmatpush3.msra.mxu0 %v2252_v30  ;;  %1640 = vmatprep.subr.mxu1 %v2070_v0  ;;  %v2487_v30 = vld [vmem:[#allocation11 + $0x1c8] sm:$0xff] }
 0x15e   :  { %1689 = vmatprep.subr.mxu0 %v2070_v0  ;;  %1641 = vmatpush3.msra.mxu1 %v2477_v26 }
 0x15f   :  { %1690 = vmatpush3.msra.mxu0 %v2260_v32  ;;  %1642 = vmatprep.subr.mxu1 %v2070_v0  ;;  %v2491_v32 = vld [vmem:[#allocation11 + $0x1c0] sm:$0xff] }
 0x160   :  { %1691 = vmatprep.subr.mxu0 %v2070_v0  ;;  %1643 = vmatpush3.msra.mxu1 %v2481_v28 }
 0x161   :  { %1692 = vmatpush3.msra.mxu0 %v2266_v33  ;;  %1644 = vmatprep.subr.mxu1 %v2070_v0 }
 0x162   :  { %1693 = vmatprep.subr.mxu0 %v2070_v0  ;;  %1645 = vmatpush3.msra.mxu1 %v2487_v30 }
 0x163   :  { %1694 = vmatpush3.msra.mxu0 %v2278_v35  ;;  %1646 = vmatprep.subr.mxu1 %v2070_v0 }
 0x164   :  { %1695 = vmatprep.subr.mxu0 %v2070_v0  ;;  %1647 = vmatpush3.msra.mxu1 %v2491_v32 }
 0x165   :  { %1696 = vmatpush3.msra.mxu0 %v2286_v37  ;;  %1712 = vmatprep.subr.mxu1 %v2070_v0 }
 0x166   :  { %1697 = vmatprep.subr.mxu0 %v2070_v0 }
 0x167   :  { %1698 = vmatpush3.msra.mxu0 %v2292_v39 }
 0x168   :  { %1699 = vmatprep.subr.mxu0 %v2070_v0 }
 0x169   :  { %1700 = vmatpush3.msra.mxu0 %v2297_v40 }
 0x16a   :  { %1701 = vmatprep.subr.mxu0 %v2070_v0 }
 0x16b   :  { %1702 = vmatpush3.msra.mxu0 %v2301_v41  ;;  %v467_v41 = vsub.s32 2, %v2320_v46 }
 0x16c   :  { %1703 = vmatprep.subr.mxu0 %v2070_v0 }
 0x16d   :  { %1704 = vmatpush3.msra.mxu0 %v2305_v42  ;;  %v2499_v42 = vrot.slane %v2323_v48, %v467_v41 }
 0x16e   :  { %1705 = vmatprep.subr.mxu0 %v2070_v0 }
 0x16f   :  { %1706 = vmatpush3.msra.mxu0 %v2311_v43 }
 0x170   :  { %1707 = vmatprep.subr.mxu0 %v2070_v0 }
 0x171   :  { %1708 = vmatpush3.msra.mxu0 %v2315_v44 }
 0x172   :  { %1747 = vmatprep.subr.mxu0 %v2070_v0 }
 0x1e2   :  { %v452_v33 = vpop.f32.mrf.mxu1 }
 0x1e4   :  { %v1596_v35 = vpop.f32.mrf.mxu1 }
 0x1ee   :  { %v382_v37 = vpop.f32.mrf.mxu0 }
 0x1ef   :  { %v2495_v39 = vadd.f32 %v452_v33, %v382_v37 }
 0x1f0   :  { %v1561_v40 = vpop.f32.mrf.mxu0 }
 0x1fe   :  { %v539_v43 = vpop.f32.mrf.mxu0 }
 0x1ff   :  { %v540_v44 = vadd.f32 %v539_v43, %v2499_v42  ;;  %v1105_v43 = vsub.s32 4, %v2320_v46 }
 0x200   :  { %v1615_v53 = vpop.f32.mrf.mxu0 }
 0x201   :  { %v543_v54 = vmax.f32 %v540_v44, 0.0  ;;  %v1106_v44 = vrot.slane %v2323_v48, %v1105_v43 }
 0x203   :  { %1649 = vmatmul.mubr.f32.vlgmr.msra.gmra.mxu1 %v543_v54 }
 0x204   :  { %1713 = vmatpush3.msra.mxu1 %v2157_v5  ;;  %1744 = vmatprep.mubr.msk.f32.mxu1 %vm2071_vm0, %v2070_v0 }
 0x205   :  { %1714 = vmatprep.subr.mxu1 %v2070_v0 }
 0x206   :  { %1715 = vmatpush3.msra.mxu1 %v2159_v6  ;;  %v712_v56 = vpop.f32.mrf.mxu0 }
 0x207   :  { %1716 = vmatprep.subr.mxu1 %v2070_v0 }
 0x208   :  { %1717 = vmatpush3.msra.mxu1 %v2173_v10  ;;  %v1661_v57 = vpop.f32.mrf.mxu0 }
 0x209   :  { %1718 = vmatprep.subr.mxu1 %v2070_v0 }
 0x20a   :  { %1719 = vmatpush3.msra.mxu1 %v2182_v12 }
 0x20b   :  { %1720 = vmatprep.subr.mxu1 %v2070_v0 }
 0x20c   :  { %1721 = vmatpush3.msra.mxu1 %v2190_v14  ;;  %v713_v14 = vadd.f32 %v712_v56, %v2326_v49 }
 0x20d   :  { %1722 = vmatprep.subr.mxu1 %v2070_v0 }
 0x20e   :  { %1723 = vmatpush3.msra.mxu1 %v2198_v16  ;;  %v716_v16 = vmax.f32 %v713_v14, 0.0  ;;  %v1223_v14 = vld [vmem:[#allocation11 + $0x338] sm:$0xff] }
 0x20f   :  { %1724 = vmatprep.subr.mxu1 %v2070_v0 }
 0x210   :  { %1725 = vmatpush3.msra.mxu1 %v2206_v18  ;;  %v932_v18 = vld [vmem:[%s2654_s5] sm:$0xff]  ;;  %s2072_s5 = smov [#allocation14]  }
 0x211   :  { %1726 = vmatprep.subr.mxu1 %v2070_v0  ;;  %s1305_s15 = sshll.u32 %s2072_s5, 4  ;;  %s1306_s15 = int_to_ptr.vmem [resolvable:$true] %s1305_s15 }
 0x212   :  { %1727 = vmatpush3.msra.mxu1 %v2216_v21  ;;  %v787_v5 = vpop.f32.mrf.mxu0  ;;  %v633_v21 = vsub.s32 3, %v2320_v46  ;;  %s2031_s16 = scalar_lea.vmem %s1306_s15, 128  ;;  %p2036_p8 = scmp.lt.s32.totalorder %s1306_s15, %s1306_s15 }
 0x213   :  { %v788_v6 = vadd.f32 %v787_v5, %v2333_v55  ;;  %1728 = vmatprep.subr.mxu1 %v2070_v0  ;;  %p2032_p7 = scmp.ne.s32.totalorder %s1306_s15, %s2031_s16  ;;  %p2037_p9 = scmp.lt.s32.totalorder %s2031_s16, %s2031_s16 }
 0x214   :  { %1729 = vmatpush3.msra.mxu1 %v2224_v23  ;;  %v1676_v10 = vpop.f32.mrf.mxu0  ;;  %v634_v23 = vrot.slane %v2323_v48, %v633_v21  ;;  %v1220_v21 = vld [vmem:[#allocation11 + $0x320] sm:$0xff] }
 0x215   :  { %v791_v12 = vmax.f32 %v788_v6, 0.0  ;;  %1730 = vmatprep.subr.mxu1 %v2070_v0  ;;  %p2038_p10 = por %p2037_p9, %p2036_p8 }
 0x216   :  { %1731 = vmatpush3.msra.mxu1 %v2232_v25 }
 0x217   :  { %1732 = vmatprep.subr.mxu1 %v2070_v0  ;;  %1710 = vmatmul.mubr.f32.vlgmr.msra.gmra.mxu0 %v791_v12  ;;  %p2039_p11 = pnand %p2038_p10, %p2032_p7 }
 0x218   :  { %1733 = vmatpush3.msra.mxu1 %v2240_v27  ;;  %1748 = vmatpush3.msra.mxu0 %v2336_v60 }
 0x219   :  { %1734 = vmatprep.subr.mxu1 %v2070_v0  ;;  %1749 = vmatprep.subr.mxu0 %v2070_v0 }
 0x21a   :  { %1735 = vmatpush3.msra.mxu1 %v2248_v29  ;;  %1750 = vmatpush3.msra.mxu0 %v2338_v61 }
 0x21b   :  { %1736 = vmatprep.subr.mxu1 %v2070_v0  ;;  %1751 = vmatprep.subr.mxu0 %v2070_v0 }
 0x21c   :  { %1737 = vmatpush3.msra.mxu1 %v2256_v31  ;;  %1752 = vmatpush3.msra.mxu0 %v2344_v62 }
 0x21d   :  { %1738 = vmatprep.subr.mxu1 %v2070_v0  ;;  %1753 = vmatprep.subr.mxu0 %v2070_v0 }
 0x21e   :  { %1739 = vmatpush3.msra.mxu1 %v2275_v34  ;;  %1754 = vmatpush3.msra.mxu0 %v2348_v63  ;;  %v1102_v63 = vld [vmem:[#allocation11 + $0x2b8] sm:$0xff] }
 0x21f   :  { %1740 = vmatprep.subr.mxu1 %v2070_v0  ;;  %1755 = vmatprep.subr.mxu0 %v2070_v0 }
 0x220   :  { %1741 = vmatpush3.msra.mxu1 %v2282_v36  ;;  %1756 = vmatpush3.msra.mxu0 %v2352_v7  ;;  %v1101_v7 = vld [vmem:[#allocation11 + $0x2b0] sm:$0xff] }
 0x221   :  { %1742 = vmatprep.subr.mxu1 %v2070_v0  ;;  %1757 = vmatprep.subr.mxu0 %v2070_v0 }
 0x222   :  { %1743 = vmatpush3.msra.mxu1 %v2290_v38  ;;  %1758 = vmatpush3.msra.mxu0 %v2356_v19  ;;  %v1100_v19 = vld [vmem:[#allocation11 + $0x2a8] sm:$0xff] }
 0x223   :  { %1745 = vmatmul.mubr.f32.vlgmr.msra.gmra.mxu1 %v716_v16  ;;  %1759 = vmatprep.subr.mxu0 %v2070_v0  ;;  %v1222_v16 = vld [vmem:[#allocation11 + $0x330] sm:$0xff] }
 0x224   :  { %1760 = vmatpush3.msra.mxu0 %v2360_v47  ;;  %1763 = vmatprep.mubr.msk.f32.mxu0 %vm2071_vm0, %v2070_v0  ;;  %v1099_v47 = vld [vmem:[#allocation11 + $0x2a0] sm:$0xff] }
 0x225   :  { %1761 = vmatprep.subr.mxu0 %v2070_v0  ;;  %1766 = vmatprep.subr.mxu1 %v2070_v0 }
 0x226   :  { %1762 = vmatpush3.msra.mxu0 %v2364_v50  ;;  %1767 = vmatpush3.msra.mxu1 %v2414_v2  ;;  %v1098_v50 = vld [vmem:[#allocation11 + $0x298] sm:$0xff] }
 0x227   :  { %1764 = vmatmul.mubr.msk.f32.vlgmr.msra.gmra.mxu0 %vm469_vm3, %v932_v18  ;;  %1768 = vmatprep.subr.mxu1 %v2070_v0  ;;  %v1221_v18 = vld [vmem:[#allocation11 + $0x328] sm:$0xff] }
 0x228   :  { %1769 = vmatpush3.msra.mxu1 %v2420_v3  ;;  %1798 = vmatprep.mubr.msk.f32.mxu1 %vm2071_vm0, %v2070_v0 }
 0x229   :  { %1770 = vmatprep.subr.mxu1 %v2070_v0  ;;  %1801 = vmatprep.subr.mxu0 %v2070_v0 }
 0x22a   :  { %1771 = vmatpush3.msra.mxu1 %v2422_v4  ;;  %1833 = vmatprep.mubr.msk.f32.mxu0 %vm2071_vm0, %v2070_v0  ;;  %v1097_v4 = vld [vmem:[#allocation11 + $0x290] sm:$0xff] }
 0x22b   :  { %1772 = vmatprep.subr.mxu1 %v2070_v0  ;;  %1802 = vmatpush3.msra.mxu0 %v1102_v63  ;;  %v1209_v63 = vld [vmem:[#allocation11 + $0x2c8] sm:$0xff] }
 0x22c   :  { %1773 = vmatpush3.msra.mxu1 %v2428_v8  ;;  %1803 = vmatprep.subr.mxu0 %v2070_v0  ;;  %v1096_v8 = vld [vmem:[#allocation11 + $0x288] sm:$0xff] }
 0x22d   :  { %1774 = vmatprep.subr.mxu1 %v2070_v0  ;;  %1804 = vmatpush3.msra.mxu0 %v1101_v7  ;;  %v1208_v7 = vld [vmem:[#allocation11 + $0x2c0] sm:$0xff] }
 0x22e   :  { %1775 = vmatpush3.msra.mxu1 %v2434_v9  ;;  %1805 = vmatprep.subr.mxu0 %v2070_v0  ;;  %v1095_v9 = vld [vmem:[#allocation11 + $0x280] sm:$0xff] }
 0x22f   :  { %1776 = vmatprep.subr.mxu1 %v2070_v0  ;;  %1806 = vmatpush3.msra.mxu0 %v1100_v19 }
 0x230   :  { %1777 = vmatpush3.msra.mxu1 %v2440_v11  ;;  %1807 = vmatprep.subr.mxu0 %v2070_v0  ;;  %v1094_v11 = vld [vmem:[#allocation11 + $0x278] sm:$0xff] }
 0x231   :  { %1778 = vmatprep.subr.mxu1 %v2070_v0  ;;  %1808 = vmatpush3.msra.mxu0 %v1099_v47 }
 0x232   :  { %1779 = vmatpush3.msra.mxu1 %v2450_v13  ;;  %1809 = vmatprep.subr.mxu0 %v2070_v0  ;;  %v1093_v13 = vld [vmem:[#allocation11 + $0x270] sm:$0xff] }
 0x233   :  { %1780 = vmatprep.subr.mxu1 %v2070_v0  ;;  %1810 = vmatpush3.msra.mxu0 %v1098_v50 }
 0x234   :  { %1781 = vmatpush3.msra.mxu1 %v2456_v15  ;;  %1811 = vmatprep.subr.mxu0 %v2070_v0  ;;  %v1092_v15 = vld [vmem:[#allocation11 + $0x268] sm:$0xff] }
 0x235   :  { %1782 = vmatprep.subr.mxu1 %v2070_v0  ;;  %1812 = vmatpush3.msra.mxu0 %v1097_v4 }
 0x236   :  { %1783 = vmatpush3.msra.mxu1 %v2458_v17  ;;  %1813 = vmatprep.subr.mxu0 %v2070_v0  ;;  %v1091_v17 = vld [vmem:[#allocation11 + $0x260] sm:$0xff] }
 0x237   :  { %1784 = vmatprep.subr.mxu1 %v2070_v0  ;;  %1814 = vmatpush3.msra.mxu0 %v1096_v8 }
 0x238   :  { %1785 = vmatpush3.msra.mxu1 %v2464_v20  ;;  %1815 = vmatprep.subr.mxu0 %v2070_v0  ;;  %v1090_v20 = vld [vmem:[#allocation11 + $0x258] sm:$0xff] }
 0x239   :  { %1786 = vmatprep.subr.mxu1 %v2070_v0  ;;  %1816 = vmatpush3.msra.mxu0 %v1095_v9 }
 0x23a   :  { %1787 = vmatpush3.msra.mxu1 %v2469_v22  ;;  %1817 = vmatprep.subr.mxu0 %v2070_v0  ;;  %v1089_v22 = vld [vmem:[#allocation11 + $0x250] sm:$0xff] }
 0x23b   :  { %1788 = vmatprep.subr.mxu1 %v2070_v0  ;;  %1818 = vmatpush3.msra.mxu0 %v1094_v11 }
 0x23c   :  { %1789 = vmatpush3.msra.mxu1 %v2473_v24  ;;  %1819 = vmatprep.subr.mxu0 %v2070_v0  ;;  %v1088_v24 = vld [vmem:[#allocation11 + $0x248] sm:$0xff] }
 0x23d   :  { %1790 = vmatprep.subr.mxu1 %v2070_v0  ;;  %1820 = vmatpush3.msra.mxu0 %v1093_v13 }
 0x23e   :  { %1791 = vmatpush3.msra.mxu1 %v2477_v26  ;;  %1821 = vmatprep.subr.mxu0 %v2070_v0  ;;  %v1087_v26 = vld [vmem:[#allocation11 + $0x240] sm:$0xff] }
 0x23f   :  { %1792 = vmatprep.subr.mxu1 %v2070_v0  ;;  %1822 = vmatpush3.msra.mxu0 %v1092_v15 }
 0x240   :  { %1793 = vmatpush3.msra.mxu1 %v2481_v28  ;;  %1823 = vmatprep.subr.mxu0 %v2070_v0 }
 0x241   :  { %1794 = vmatprep.subr.mxu1 %v2070_v0  ;;  %1824 = vmatpush3.msra.mxu0 %v1091_v17 }
 0x242   :  { %1795 = vmatpush3.msra.mxu1 %v2487_v30  ;;  %1825 = vmatprep.subr.mxu0 %v2070_v0 }
 0x243   :  { %1796 = vmatprep.subr.mxu1 %v2070_v0  ;;  %1826 = vmatpush3.msra.mxu0 %v1090_v20 }
 0x244   :  { %1797 = vmatpush3.msra.mxu1 %v2491_v32  ;;  %1827 = vmatprep.subr.mxu0 %v2070_v0 }
 0x245   :  { %1836 = vmatprep.subr.mxu1 %v2070_v0  ;;  %1828 = vmatpush3.msra.mxu0 %v1089_v22 }
 0x246   :  { %1829 = vmatprep.subr.mxu0 %v2070_v0 }
 0x247   :  { %1830 = vmatpush3.msra.mxu0 %v1088_v24 }
 0x248   :  { %1831 = vmatprep.subr.mxu0 %v2070_v0 }
 0x249   :  { %1832 = vmatpush3.msra.mxu0 %v1087_v26 }
 0x2c3   :  { %v626_v25 = vpop.f32.mrf.mxu1 }
 0x2c4   :  { %v630_v27 = vadd.f32 %v626_v25, %v2495_v39 }
 0x2c5   :  { %v1650_v29 = vpop.f32.mrf.mxu1 }
 0x2c6   :  { %v2599_v31 = vadd.f32 %v634_v23, %v630_v27 }
 0x2c8   :  { %v636_v34 = vmul.f32 %v2599_v31, %v2599_v31 }
 0x2ca   :  { %637 = vadd.xlane.f32.xlu0 %v636_v34 }
 0x2d7   :  { %v858_v36 = vpop.f32.mrf.mxu0 }
 0x2d9   :  { %v1711_v38 = vpop.f32.mrf.mxu0 }
 0x2da   :  { %v1218_v38 = vld [vmem:[#allocation11 + $0x310] sm:$0xff] }
 0x2e3   :  { %v928_v49 = vpop.f32.mrf.mxu1 }
 0x2e4   :  { %v929_v55 = vadd.f32 %v928_v49, %v858_v36  ;;  %v1219_v36 = vld [vmem:[#allocation11 + $0x318] sm:$0xff]  ;;  %v1217_v49 = vld [vmem:[#allocation11 + $0x308] sm:$0xff] }
 0x2e5   :  { %v1746_v58 = vpop.f32.mrf.mxu1 }
 0x2e6   :  { %v1214_v58 = vld [vmem:[#allocation11 + $0x2f0] sm:$0xff] }
 0x2e7   :  { %v1002_v59 = vpop.f32.mrf.mxu0 }
 0x2e8   :  { %v1003_v60 = vadd.f32 %v1002_v59, %v2499_v42  ;;  %v1213_v59 = vld [vmem:[#allocation11 + $0x2e8] sm:$0xff] }
 0x2e9   :  { %v1765_v61 = vpop.f32.mrf.mxu0 }
 0x2ea   :  { %v1006_v62 = vmax.f32 %v1003_v60, 0.0  ;;  %v1212_v60 = vld [vmem:[#allocation11 + $0x2e0] sm:$0xff]  ;;  %v1211_v61 = vld [vmem:[#allocation11 + $0x2d8] sm:$0xff] }
 0x2ec   :  { %1799 = vmatmul.mubr.f32.vlgmr.msra.gmra.mxu1 %v1006_v62  ;;  %v1210_v62 = vld [vmem:[#allocation11 + $0x2d0] sm:$0xff] }
 0x2ed   :  { %1868 = vmatprep.mubr.msk.f32.mxu1 %vm2071_vm0, %v2070_v0  ;;  %1837 = vmatpush3.msra.mxu1 %v1223_v14 }
 0x2ee   :  { %1838 = vmatprep.subr.mxu1 %v2070_v0 }
 0x2ef   :  { %1839 = vmatpush3.msra.mxu1 %v1222_v16 }
 0x2f0   :  { %1840 = vmatprep.subr.mxu1 %v2070_v0 }
 0x2f1   :  { %1841 = vmatpush3.msra.mxu1 %v1221_v18 }
 0x2f2   :  { %1842 = vmatprep.subr.mxu1 %v2070_v0 }
 0x2f3   :  { %1843 = vmatpush3.msra.mxu1 %v1220_v21 }
 0x2f4   :  { %1844 = vmatprep.subr.mxu1 %v2070_v0 }
 0x2f5   :  { %1845 = vmatpush3.msra.mxu1 %v1219_v36 }
 0x2f6   :  { %1846 = vmatprep.subr.mxu1 %v2070_v0 }
 0x2f7   :  { %1847 = vmatpush3.msra.mxu1 %v1218_v38 }
 0x2f8   :  { %1848 = vmatprep.subr.mxu1 %v2070_v0 }
 0x2f9   :  { %1849 = vmatpush3.msra.mxu1 %v1217_v49 }
 0x2fa   :  { %1850 = vmatprep.subr.mxu1 %v2070_v0 }
 0x353   :  { %v638_v28 = vpop.xlane.xlu0 %637 }
 0x354   :  { %v639_v30 = vmax.f32 %v638_v28, 1e-24 }
 0x356   :  { %1883 = vrsqrt.f32 %v639_v30 }
 0x363   :  { %v1884_v35 = vpop.eup %1883 }
 0x364   :  { %v641_v39 = vmul.f32 %v1884_v35, %v2599_v31 }
 0x3ac   :  { %v1073_v51 = vpop.f32.mrf.mxu1 }
 0x3ad   :  { %v1077_v52 = vadd.f32 %v1073_v51, %v929_v55  ;;  %v1216_v55 = vld [vmem:[#allocation11 + $0x300] sm:$0xff]  ;;  %v1200_v51 = vsub.s32 5, %v2320_v46 }
 0x3ae   :  { %v1800_v1 = vpop.f32.mrf.mxu1  ;;  %1851 = vmatpush3.msra.mxu1 %v1216_v55 }
 0x3af   :  { %v1078_v2 = vadd.f32 %v1077_v52, %v634_v23  ;;  %v1184_v23 = vand.u32 127, %v119_v45  ;;  %v1215_v45 = vld [vmem:[#allocation11 + $0x2f8] sm:$0xff]  ;;  %1852 = vmatprep.subr.mxu1 %v2070_v0  ;;  %v1205_v52 = vsub.s32 6, %v2320_v46  ;;  %v1201_v1 = vrot.slane %v2323_v48, %v1200_v51 }
 0x3b0   :  { %1853 = vmatpush3.msra.mxu1 %v1215_v45 }
 0x3b1   :  { %v1079_v3 = vmul.f32 %v1078_v2, %v1078_v2  ;;  %vm1185_vm4 = vcmp.lt.s32.totalorder %v1184_v23, 96  ;;  %1854 = vmatprep.subr.mxu1 %v2070_v0  ;;  %v1206_v4 = vrot.slane %v2323_v48, %v1205_v52 }
 0x3b2   :  { %1855 = vmatpush3.msra.mxu1 %v1214_v58 }
 0x3b3   :  { %1080 = vadd.xlane.f32.xlu0 %v1079_v3  ;;  %1856 = vmatprep.subr.mxu1 %v2070_v0 }
 0x3b4   :  { %1857 = vmatpush3.msra.mxu1 %v1213_v59 }
 0x3b5   :  { %1858 = vmatprep.subr.mxu1 %v2070_v0 }
 0x3b6   :  { %1859 = vmatpush3.msra.mxu1 %v1212_v60 }
 0x3b7   :  { %1860 = vmatprep.subr.mxu1 %v2070_v0 }
 0x3b8   :  { %1861 = vmatpush3.msra.mxu1 %v1211_v61 }
 0x3b9   :  { %1862 = vmatprep.subr.mxu1 %v2070_v0 }
 0x3ba   :  { %1863 = vmatpush3.msra.mxu1 %v1210_v62 }
 0x3bb   :  { %1864 = vmatprep.subr.mxu1 %v2070_v0 }
 0x3bc   :  { %1865 = vmatpush3.msra.mxu1 %v1209_v63 }
 0x3bd   :  { %1866 = vmatprep.subr.mxu1 %v2070_v0  ;;  %v1226_v0 = vsub.s32 7, %v2320_v46 }
 0x3be   :  { %1867 = vmatpush3.msra.mxu1 %v1208_v7 }
 0x3bf   :  { %v1227_v11 = vrot.slane %v2323_v48, %v1226_v0 }
 0x43c   :  { %v1081_v32 = vpop.xlane.xlu0 %1080 }
 0x43d   :  { %v1082_v33 = vmax.f32 %v1081_v32, 1e-24 }
 0x43f   :  { %1885 = vrsqrt.f32 %v1082_v33 }
 0x44c   :  { %v1886_v37 = vpop.eup %1885 }
 0x44d   :  { %v1084_v40 = vmul.f32 %v1886_v37, %v1078_v2 }
 0x44f   :  { %v1085_v41 = vsub.f32 %v641_v39, %v1084_v40 }
 0x451   :  { %v1086_v42 = vand.u32 2147483647, %v1085_v41 }
 0x453   :  { %1834 = vmatmul.mubr.f32.vlgmr.msra.gmra.mxu0 %v1086_v42 }
 0x513   :  { %v1173_v53 = vpop.f32.mrf.mxu0 }
 0x514   :  { %v1174_v54 = vadd.f32 %v1173_v53, %v1106_v44 }
 0x515   :  { %v1835_v56 = vpop.f32.mrf.mxu0 }
 0x516   :  { %v1179_v57 = vmul.f32 0.70710677, %v1174_v54  ;;  %v1177_v6 = vmul.f32 0.5, %v1174_v54 }
 0x518   :  { %1887 = verf.f32 %v1179_v57 }
 0x525   :  { %v1888_v5 = vpop.eup %1887 }
 0x526   :  { %v1181_v10 = vadd.f32 1.0, %v1888_v5 }
 0x528   :  { %v1182_v12 = vmul.f32 %v1181_v10, %v1177_v6 }
 0x52a   :  { %1186 = vadd.xlane.f32.xlu1 %v1182_v12 }
 0x5b3   :  { %v1187_v25 = vpop.xlane.xlu1 %1186 }
 0x5b4   :  { %v1188_v27 = vmul.f32 0.010416667, %v1187_v25 }
 0x5b6   :  { %v1189_v29 = vsub.f32 %v1182_v12, %v1188_v27 }
 0x5b8   :  { %v1190_v31 = vsel %vm1185_vm4, %v1189_v29, 0.0 }
 0x5b9   :  { %v1191_v34 = vmul.f32 %v1190_v31, %v1190_v31 }
 0x5bb   :  { %1192 = vadd.xlane.f32.xlu1 %v1191_v34 }
 0x644   :  { %v1193_v19 = vpop.xlane.xlu1 %1192 }
 0x645   :  { %v1194_v47 = vmul.f32 0.010416667, %v1193_v19 }
 0x647   :  { %v1195_v50 = vadd.f32 1e-05, %v1194_v47 }
 0x649   :  { %1889 = vrsqrt.f32 %v1195_v50 }
 0x656   :  { %v1890_v2 = vpop.eup %1889 }
 0x657   :  { %v1197_v3 = vmul.f32 %v1890_v2, %v1190_v31 }
 0x659   :  { %v1202_v8 = vmul.f32 %v1201_v1, %v1197_v3 }
 0x65b   :  { %v1207_v9 = vadd.f32 %v1206_v4, %v1202_v8 }
 0x65d   :  { %1869 = vmatmul.mubr.f32.vlgmr.msra.gmra.mxu1 %v1207_v9 }
 0x71d   :  { %v1294_v13 = vpop.f32.mrf.mxu1 }
 0x71e   :  { %v1295_v15 = vadd.f32 %v1294_v13, %v1227_v11 }
 0x71f   :  { %v1870_v17 = vpop.f32.mrf.mxu1 }
 0x720   :  { %1298 = vst [vmem:[#allocation14] sm:$0xff] %v1295_v15 }
 0x721   :  { %2042 = shalt.err (!%p2039_p11)
}
 0x722   :  { %1308 = dma.vmem_to_hbm [thread:$0]  %s1306_s15, 128, %s2657_s8, [#allocation4]  }
 0x723   :  { %2059 = dma.done.wait [#allocation4], 128  }
 0x724   :  { %2060 = vsyncadd [#allocation4], 4294967168 }
 0x725   :  { %1312 = vsyncpa [#allocation3], 1 }
 0x726   :  { %1313 = vsyncpa [#allocation6], 1 }
 0x727   :  { %1314 = vsyncpa [#allocation9], 1 }
 0x728   :  { %1315 = vsyncpa [#allocation12], 1 }
 0x729   :  { %1316 = vsyncpa [#allocation4], 1 }

</bundles_post_ra>
